<compile_context>
chip_gen: v7x
topology: tpu7x:2x2x1
jax: 0.10.0
libtpu: 0.0.40
codegen_flags: <defaults>
</compile_context>

<pallas_src>
import jax
import jax.numpy as jnp
from jax.experimental import pallas as pl
from jax.experimental.pallas import tpu as pltpu


def _round_up(a, b):
    return (a + b - 1) // b * b


def _parity_matmul_kernel(cols_ref, w_ref, b_ref, o_ref):
    # cols_ref: (1, CKKp, T)     im2col'd 3x3 patches of the un-dilated input (one HW tile)
    # w_ref   : (4*Cout, CKKp)   stacked parity weights
    # b_ref   : (4*Cout, 1)      bias (f32), repeated per parity group
    # o_ref   : (1, 4*Cout, T)   pre-interleave output (f32)
    acc = jnp.dot(w_ref[...], cols_ref[0],
                  preferred_element_type=jnp.float32)       # MXU, f32 accumulate
    acc = acc + b_ref[...]                                   # bias
    acc = jnp.maximum(acc, 0.0)                              # relu
    o_ref[0] = jnp.tanh(acc).astype(o_ref.dtype)             # tanh (EUP)


def conv_transpose_relu_tanh(x, w, b, *, stride=2, padding=2,
                             tile_hw=4096, compute_dtype=jnp.bfloat16):
    """x: (N, Cin, H, W); w: (Cin, Cout, K, K) [PyTorch ConvTranspose2d layout]; b: (Cout,)."""
    N, Cin, H, W = x.shape
    _, Cout, K, _ = w.shape
    # TODO(synk): generalize the parity decomposition beyond stride=2, K=5, padding=2
    # (the module's configuration).
    assert stride == 2 and K == 5 and padding == 2
    assert tile_hw % 128 == 0
    OH = (H - 1) * stride - 2 * padding + K
    OW = (W - 1) * stride - 2 * padding + K

    # ---- weights: ConvTranspose -> equivalent conv, then parity (sub-pixel) split -------
    w_conv = jnp.flip(w, axis=(2, 3)).transpose(1, 0, 2, 3)          # (Cout, Cin, K, K)
    # For output pixel (2*ry+py, 2*rx+px), only taps with kh≡py, kw≡px (mod 2) hit real
    # input; they read the 1-padded input x1 at (ry + (py+kh)//2, rx + (px+kw)//2).
    w3 = jnp.zeros((2, 2, Cout, Cin, 3, 3), w.dtype)
    for py in range(2):
        for px in range(2):
            sub = w_conv[:, :, py::2, px::2]                          # (Cout, Cin, nr, nc)
            nr, nc = sub.shape[2], sub.shape[3]
            w3 = w3.at[py, px, :, :, py:py + nr, px:px + nc].set(sub)
    CKK = Cin * 9
    M = 4 * Cout                                                      # 128: full MXU rows
    w_all = w3.reshape(M, CKK)                                        # row = (2py+px)*Cout+co
    b_all = jnp.tile(b, 4).reshape(M, 1).astype(jnp.float32)

    # ---- 3x3 im2col on the 1-padded, un-dilated input (small: Cin*9*H*W elements) -------
    x1 = jnp.pad(x, ((0, 0), (0, 0), (1, 1), (1, 1)))                 # (N, Cin, H+2, W+2)
    patches = [x1[:, :, r:r + H, c:c + W] for r in range(3) for c in range(3)]
    cols = jnp.stack(patches, axis=2).reshape(N, CKK, H * W)          # (N, Cin*9, H*W)

    # ---- pad for lane-dense tiling and clean bf16 sublane layout -------------------------
    HW = H * W
    T = min(tile_hw, _round_up(HW, 128))                              # lane-dense tile
    HWp = _round_up(HW, T)
    CKKp = _round_up(CKK, 32)
    cols = jnp.pad(cols, ((0, 0), (0, CKKp - CKK), (0, HWp - HW))).astype(compute_dtype)
    w_all = jnp.pad(w_all, ((0, 0), (0, CKKp - CKK))).astype(compute_dtype)

    # Per-step VMEM (T=4096, bf16 cols, f32 out), double-buffered: ~4.6 MB -> fits the
    # default scoped VMEM on v5e/v6e/v7x; no vmem_limit_bytes override required.
    out_flat = pl.pallas_call(
        _parity_matmul_kernel,
        out_shape=jax.ShapeDtypeStruct((N, M, HWp), jnp.float32),
        grid_spec=pltpu.PrefetchScalarGridSpec(
            num_scalar_prefetch=0,
            grid=(N, HWp // T),
            in_specs=[
                pl.BlockSpec((1, CKKp, T), lambda n, t: (n, 0, t)),
                pl.BlockSpec((M, CKKp), lambda n, t: (0, 0)),
                pl.BlockSpec((M, 1), lambda n, t: (0, 0)),
            ],
            out_specs=pl.BlockSpec((1, M, T), lambda n, t: (n, 0, t)),
        ),
        compiler_params=pltpu.CompilerParams(
            dimension_semantics=("parallel", "parallel")),
    )(cols, w_all, b_all)

    # ---- parity interleave (depth-to-space) + crop to the true output extent ------------
    y = out_flat[:, :, :HW].reshape(N, 2, 2, Cout, H, W)              # (n, py, px, co, ry, rx)
    y = y.transpose(0, 3, 4, 1, 5, 2).reshape(N, Cout, 2 * H, 2 * W)  # (n, co, 2ry+py, 2rx+px)
    return y[:, :, :OH, :OW]


def _reference(x, w, b, *, stride=2, padding=2):
    """Pure-JAX reference using lax.conv_general_dilated (transposed conv semantics)."""
    Cin, Cout, K, _ = w.shape
    w_conv = jnp.flip(w, axis=(2, 3)).transpose(1, 0, 2, 3)  # OIHW
    y = jax.lax.conv_general_dilated(
        x, w_conv,
        window_strides=(1, 1),
        padding=[(K - 1 - padding, K - 1 - padding)] * 2,
        lhs_dilation=(stride, stride),
        dimension_numbers=("NCHW", "OIHW", "NCHW"),
    )
    y = y + b.reshape(1, Cout, 1, 1)
    return jnp.tanh(jnp.maximum(y, 0.0))


if __name__ == "__main__":
    key = jax.random.PRNGKey(0)
    kx, kw, kb = jax.random.split(key, 3)

    # Small shapes consistent with the module (module uses N=1, H=W=224).
    N, Cin, H, W = 2, 3, 16, 16
    Cout, K = 32, 5

    x = jax.random.normal(kx, (N, Cin, H, W), dtype=jnp.float32)
    bound = 1.0 / jnp.sqrt(jnp.float32(Cin * K * K))
    w = jax.random.uniform(kw, (Cin, Cout, K, K), jnp.float32, -bound, bound)
    b = jax.random.uniform(kb, (Cout,), jnp.float32, -bound, bound)

    ref = _reference(x, w, b, stride=2, padding=2)

    # 1) f32 compute path with a small tile (exercises multi-tile pipelining): tight check.
    out_f32 = conv_transpose_relu_tanh(x, w, b, stride=2, padding=2,
                                       tile_hw=128, compute_dtype=jnp.float32)
    out_f32 = jax.block_until_ready(out_f32)
    assert out_f32.shape == (N, Cout, 2 * H - 1, 2 * W - 1), out_f32.shape
    err_f32 = float(jnp.max(jnp.abs(out_f32 - ref)))
    assert err_f32 < 1e-4, err_f32

    # 2) default perf path (bf16 matmul operands, f32 accumulate): bf16-level tolerance.
    out_bf16 = conv_transpose_relu_tanh(x, w, b, stride=2, padding=2)
    out_bf16 = jax.block_until_ready(out_bf16)
    assert out_bf16.shape == (N, Cout, 2 * H - 1, 2 * W - 1), out_bf16.shape
    err_bf16 = float(jnp.max(jnp.abs(out_bf16 - ref)))
    assert err_bf16 < 2e-2, err_bf16

    print("KERNEL_OK")
</pallas_src>

<mosaic_0001>
module attributes {stable_mosaic.version = 11 : i64} {
  func.func @_parity_matmul_kernel(%arg0: i32, %arg1: i32, %arg2: memref<1x32x128xf32, #tpu.memory_space<vmem>>, %arg3: memref<128x32xf32, #tpu.memory_space<vmem>>, %arg4: memref<128x1xf32, #tpu.memory_space<vmem>>, %arg5: memref<1x128x128xf32, #tpu.memory_space<vmem>>) attributes {dimension_semantics = [#tpu.dimension_semantics<parallel>, #tpu.dimension_semantics<parallel>], iteration_bounds = array<i64: 2, 2>, scalar_prefetch = 0 : i64, scratch_operands = 0 : i64, tpu.core_type = #tpu.core_type<tc>, window_params = [{transform_indices = @transform_0, window_bounds = array<i64: 1, 32, 128>}, {pipeline_mode = #tpu.pipeline_mode<synchronous>, transform_indices = @transform_1, window_bounds = array<i64: 128, 32>}, {pipeline_mode = #tpu.pipeline_mode<synchronous>, transform_indices = @transform_2, window_bounds = array<i64: 128, 1>}, {transform_indices = @transform_3, window_bounds = array<i64: 1, 128, 128>}]} {
    %c0 = arith.constant 0 : index
    %c0_0 = arith.constant 0 : index
    %0 = vector.load %arg3[%c0, %c0_0] : memref<128x32xf32, #tpu.memory_space<vmem>>, vector<128x32xf32>
    %c0_1 = arith.constant 0 : index
    %c0_2 = arith.constant 0 : index
    %c0_3 = arith.constant 0 : index
    %1 = vector.load %arg2[%c0_1, %c0_2, %c0_3] : memref<1x32x128xf32, #tpu.memory_space<vmem>>, vector<1x32x128xf32>
    %2 = vector.shape_cast %1 : vector<1x32x128xf32> to vector<32x128xf32>
    %cst = arith.constant dense<0.000000e+00> : vector<128x128xf32>
    %3 = tpu.matmul %0, %2, %cst {dimension_numbers = #tpu.dot_dimension_numbers<[1], [0], [0], [1], [0, 0, 1, 1], [], []>} : vector<128x32xf32>, vector<32x128xf32>, vector<128x128xf32> -> vector<128x128xf32>
    %c0_4 = arith.constant 0 : index
    %c0_5 = arith.constant 0 : index
    %4 = vector.load %arg4[%c0_4, %c0_5] : memref<128x1xf32, #tpu.memory_space<vmem>>, vector<128x1xf32>
    %5 = vector.broadcast %4 : vector<128x1xf32> to vector<128x128xf32>
    %6 = arith.addf %3, %5 : vector<128x128xf32>
    %cst_6 = arith.constant 0.000000e+00 : f32
    %7 = vector.broadcast %cst_6 : f32 to vector<128x128xf32>
    %8 = arith.maximumf %6, %7 : vector<128x128xf32>
    %9 = math.tanh %8 : vector<128x128xf32>
    %c0_7 = arith.constant 0 : index
    %c0_8 = arith.constant 0 : index
    %c0_9 = arith.constant 0 : index
    %10 = vector.load %arg5[%c0_7, %c0_8, %c0_9] : memref<1x128x128xf32, #tpu.memory_space<vmem>>, vector<1x128x128xf32>
    %11 = vector.shape_cast %10 : vector<1x128x128xf32> to vector<128x128xf32>
    %12 = vector.shape_cast %9 : vector<128x128xf32> to vector<1x128x128xf32>
    tpu.vector_store %arg5[%c0_7, %c0_8, %c0_9], %12 {strides = array<i32>} : memref<1x128x128xf32, #tpu.memory_space<vmem>>, vector<1x128x128xf32>,
    return
  }
  func.func @transform_0(%arg0: i32, %arg1: i32) -> (i32, i32, i32) {
    %c0_i32 = arith.constant 0 : i32
    %c0_i32_0 = arith.constant 0 : i32
    return %arg0, %c0_i32, %arg1 : i32, i32, i32
  }
  func.func @transform_1(%arg0: i32, %arg1: i32) -> (i32, i32) {
    %c0_i32 = arith.constant 0 : i32
    %c0_i32_0 = arith.constant 0 : i32
    %c0_i32_1 = arith.constant 0 : i32
    return %c0_i32, %c0_i32_0 : i32, i32
  }
  func.func @transform_2(%arg0: i32, %arg1: i32) -> (i32, i32) {
    %c0_i32 = arith.constant 0 : i32
    %c0_i32_0 = arith.constant 0 : i32
    %c0_i32_1 = arith.constant 0 : i32
    return %c0_i32, %c0_i32_0 : i32, i32
  }
  func.func @transform_3(%arg0: i32, %arg1: i32) -> (i32, i32, i32) {
    %c0_i32 = arith.constant 0 : i32
    %c0_i32_0 = arith.constant 0 : i32
    return %arg0, %c0_i32, %arg1 : i32, i32, i32
  }
}

</mosaic_0001>

<bundles_post_ra>
// kernel: tpu_custom_call.1
= control target key start
LH: loop header
LB: loop body
LE: loop exit
PB: predicated region body
PF: predicated region fallthrough
CT: control target
= control target key end

     0   :  { %8 = vsyncpa [#allocation4], 0  ;;  %s1296_s0 = inlined_call_operand.vmem [shape: f32[2,32,256], index: 0, kind: input, shape index: {}]   ;;  %s1297_s1 = inlined_call_operand.vmem [shape: f32[128,32], index: 1, kind: input, shape index: {}]   ;;  %s1298_s2 = inlined_call_operand.vmem [shape: f32[128,1], index: 2, kind: input, shape index: {}]   ;;  %s1299_s3 = inlined_call_operand.hbm [shape: f32[2,128,256], index: 3, kind: output, shape index: {}]  }
   0x1   :  { %10 = vsyncpa [#allocation4 + $0x1], 0  ;;  %s1014_s12 = smov 0   ;;  %s1016_s13 = smov 0  }
   0x2   :  { %s1018_s14 = smov 0   ;;  %s1020_s15 = smov 0  }
   0x3   :  { %s1022_s16 = smov 0   ;;  %s1024_s17 = smov 0  }
   0x4   :  { %s1026_s18 = smov 0   ;;  %s1028_s19 = smov 0  }
   0x5 LB: > { %s689_s20 = sadd.s32 4294967295, %s987_s19   ;;  %s690_s21 = sadd.s32 4294967294, %s987_s19   ;;  %s987_s19 = sphi %s1028_s19, %s16_s19   ;;  %s983_s18 = sphi %s1026_s18, %s1309_s18   ;;  %s979_s17 = sphi %s1024_s17, %s1308_s17   ;;  %s975_s16 = sphi %s1022_s16, %s1307_s16   ;;  %s971_s15 = sphi %s1020_s15, %s1306_s15   ;;  %s967_s14 = sphi %s1018_s14, %s1305_s14   ;;  %s963_s13 = sphi %s1016_s13, %s1304_s13   ;;  %s959_s12 = sphi %s1014_s12, %s1303_s12  }
   0x6   : > { %s25_s22 = sadd.s32 1, %s979_s17  ;;  %s28_s23 = sadd.s32 1, %s983_s18 }
   0x7   : > { %p26_p0 = scmp.ge.s32.totalorder %s25_s22, 2  ;;  %p44_p1 = scmp.ne.s32.totalorder %s967_s14, %s963_s13 }
   0x8   : > { %p45_p2 = scmp.eq.s32.totalorder %s987_s19, 0  ;;  %p118_p5 = scmp.eq.s32.totalorder %s689_s20, 3 }
   0x9   : > { %s1311_s22 = smov (%p26_p0, %s25_s22), 0  ;;  %s1313_s23 = smov (!%p26_p0, %s28_s23), %s983_s18 }
   0xa   : > { %s33_s24 = ssub.s32 %s979_s17, %s1311_s22  ;;  %p1066_p3 = por %p45_p2, %p44_p1 }
   0xb   : > { %p30_p4 = scmp.ge.s32.totalorder %s1313_s23, 2  ;;  %p123_p6 = scmp.ne.s32.totalorder %s963_s13, %s959_s12 }
   0xc   : > { %p124_p7 = scmp.eq.s32.totalorder %s690_s21, 3  ;;  %p1074_p8 = por %p118_p5, %p44_p1 }
   0xd   : > { %s1315_s23 = smov (%p30_p4, %s1313_s23), 0  ;;  %s37_s30 = sadd.s32 1, %s967_s14 }
   0xe   : > { %p1078_p9 = por %p124_p7, %p123_p6  ;;  %s32_s28 = ssub.s32 %s983_s18, %s1315_s23 }
   0xf   : > { %s34_s29 = sor.u32 %s33_s24, %s32_s28  ;;  %p692_p11 = scmp.ge.s32.totalorder %s987_s19, 4 }
  0x10   : > { %p35_p10 = scmp.eq.s32.totalorder %s34_s29, 0 }
  0x11   : > { %146 = sbr.rel (%p692_p11) target bundleno = 32 (0x20), region = 24 }
  0x12   : > { %s1086_s4 = scalar_select %p35_p10, %s967_s14, %s37_s30  }
  0x18   : > { %149 = sbr.rel (!%p1066_p3) target bundleno = 32 (0x20), region = 28  ;;  %s151_s5 = sand.u32 (%p1066_p3), 1, %s967_s14  }
  0x19   : > { %s694_s6 = sshll.u32 (%p1066_p3), %s983_s18, 3  ;;  %s693_s7 = sshll.u32 (%p1066_p3), %s151_s5, 5 }
  0x1a   : > { %s155_s8 = sadd.s32 (%p1066_p3), %s979_s17, %s694_s6  ;;  %s153_s21 = scalar_lea.vmem (%p1066_p3), [#allocation2], %s693_s7 }
  0x1b   : > { %s695_s9 = sshll.u32 (%p1066_p3), %s155_s8, 3 }
  0x1c   : > { %s157_s20 = scalar_lea.vmem (%p1066_p3), %s1296_s0, %s695_s9 }
  0x1d   : > { %v191_v0 = vld [vmem:[%s157_s20] sm:$0xff] (%p1066_p3)  ;;  %v193_v1 = vld [vmem:[%s157_s20 + $0x10] sm:$0xff] (%p1066_p3) }
  0x1e   : > { %v195_v2 = vld [vmem:[%s157_s20 + $0x20] sm:$0xff] (%p1066_p3)  ;;  %192 = vst [vmem:[%s153_s21] sm:$0xff] (%p1066_p3), %v191_v0  ;;  %194 = vst [vmem:[%s153_s21 + $0x8] sm:$0xff] (%p1066_p3), %v193_v1  ;;  %v197_v3 = vld [vmem:[%s157_s20 + $0x30] sm:$0xff] (%p1066_p3) }
  0x1f   : > { %196 = vst [vmem:[%s153_s21 + $0x10] sm:$0xff] %v195_v2  ;;  %198 = vst [vmem:[%s153_s21 + $0x18] sm:$0xff] %v197_v3 }
  0x20 PF: > { %p696_p12 = scmp.ge.s32.totalorder %s987_s19, 1  ;;  %p203_p13 = scmp.lt.s32.totalorder %s987_s19, 5 }
  0x22   : > { %p204_p0 = pnand %p696_p12, %p203_p13 }
  0x23   : > { %s1100_s24 = sand.u32 (!%p204_p0), 1, %s963_s13   ;;  %v233_v4 = vld [vmem:[%s1297_s1] sm:$0xff] (!%p204_p0)  ;;  %vm349_vm0 = vcmask (!%p204_p0), 261120   ;;  %v989_v6 = vmov (!%p204_p0), 0   ;;  %v255_v13 = vld [vmem:[%s1298_s2 + $0x10] sm:$0xff] (!%p204_p0)  ;;  %v256_v15 = vld [vmem:[%s1298_s2 + $0x18] sm:$0xff] (!%p204_p0) }
  0x24   : > { %207 = sbr.rel (%p204_p0) target bundleno = 307 (0x133), region = 66  ;;  %v241_v5 = vld [vmem:[%s1297_s1 + $0x40] sm:$0xff] (!%p204_p0)  ;;  %s697_s5 = sshll.u32 (!%p204_p0), %s1100_s24, 5  ;;  %748 = vmatprep.mubr.msk.f32.mxu0 (!%p204_p0), %vm349_vm0, %v233_v4  ;;  %860 = vset.pattern.permute.xlu1 (!%p204_p0), %v989_v6  ;;  %v254_v16 = vld [vmem:[%s1298_s2 + $0x8] sm:$0xff] (!%p204_p0)  ;;  %v235_v19 = vld [vmem:[%s1297_s1 + $0x10] sm:$0xff] (!%p204_p0) }
  0x25   : > { %760 = vmatprep.mubr.msk.f32.mxu1 (!%p204_p0), %vm349_vm0, %v241_v5  ;;  %859 = vset.pattern.permute.xlu0 (!%p204_p0), %v989_v6  ;;  %s212_s6 = scalar_lea.vmem (!%p204_p0), [#allocation2], %s697_s5  ;;  %v253_v14 = vld [vmem:[%s1298_s2] sm:$0xff] (!%p204_p0)  ;;  %v234_v17 = vld [vmem:[%s1297_s1 + $0x8] sm:$0xff] (!%p204_p0)  ;;  %v243_v20 = vld [vmem:[%s1297_s1 + $0x50] sm:$0xff] (!%p204_p0)  ;;  %s698_s28 = sshll.u32 (!%p204_p0), %s1100_s24, 7 }
  0x26   : > { %v249_v7 = vld [vmem:[%s212_s6] sm:$0xff] (!%p204_p0)  ;;  %v250_v8 = vld [vmem:[%s212_s6 + $0x8] sm:$0xff] (!%p204_p0)  ;;  %v251_v9 = vld [vmem:[%s212_s6 + $0x10] sm:$0xff] (!%p204_p0)  ;;  %281 = vperm.xlu1 (!%p204_p0), %860, %v255_v13   ;;  %271 = vperm.xlu0 (!%p204_p0), %859, %v253_v14   ;;  %s1216_s29 = scalar_lea.vmem (!%p204_p0), [#allocation3], %s698_s28  ;;  %s716_s30 = sshll.u32 (!%p204_p0), %s975_s16, 5 }
  0x27   : > { %v772_v10 = vpack.c.bf16 (!%p204_p0), %v250_v8, %v249_v7  ;;  %v252_v11 = vld [vmem:[%s212_s6 + $0x18] sm:$0xff] (!%p204_p0)  ;;  %v242_v18 = vld [vmem:[%s1297_s1 + $0x48] sm:$0xff] (!%p204_p0)  ;;  %v257_v22 = vld [vmem:[%s1298_s2 + $0x20] sm:$0xff] (!%p204_p0)  ;;  %s603_s5 = sadd.s32 (!%p204_p0), %s971_s15, %s716_s30  ;;  %s606_s6 = sshll.u32 (!%p204_p0), %s1216_s29, 4  ;;  %s1239_s6 = int_to_ptr.vmem [resolvable:$true] %s606_s6 }
  0x28   : > { %v776_v12 = vpack.c.bf16 (!%p204_p0), %v252_v11, %v251_v9  ;;  %v258_v21 = vld [vmem:[%s1298_s2 + $0x28] sm:$0xff] (!%p204_p0)  ;;  %v236_v23 = vld [vmem:[%s1297_s1 + $0x18] sm:$0xff] (!%p204_p0)  ;;  %v237_v25 = vld [vmem:[%s1297_s1 + $0x20] sm:$0xff] (!%p204_p0)  ;;  %s717_s16 = sshll.u32 (!%p204_p0), %s603_s5, 7  ;;  %s592_s9 = scalar_lea.sflag (!%p204_p0), [#allocation4], %s1100_s24 }
  0x29   : > { %773 = vmatprep.subr.bf16.mxu0 (!%p204_p0), %v772_v10  ;;  %780 = vmatprep.subr.bf16.mxu1 (!%p204_p0), %v772_v10  ;;  %v244_v24 = vld [vmem:[%s1297_s1 + $0x58] sm:$0xff] (!%p204_p0)  ;;  %v245_v26 = vld [vmem:[%s1297_s1 + $0x60] sm:$0xff] (!%p204_p0)  ;;  %v259_v28 = vld [vmem:[%s1298_s2 + $0x30] sm:$0xff] (!%p204_p0)  ;;  %s1236_s8 = scalar_lea.hbm (!%p204_p0), %s1299_s3, %s717_s16  ;;  %s893_s10 = scalar_lea.vmem (!%p204_p0), %s1239_s6, 2048 }
  0x2a   : > { %775 = vmatpush3.bf16.msra.mxu0 (!%p204_p0), %v772_v10  ;;  %782 = vmatpush3.bf16.msra.mxu1 (!%p204_p0), %v772_v10  ;;  %v260_v27 = vld [vmem:[%s1298_s2 + $0x38] sm:$0xff] (!%p204_p0)  ;;  %v238_v29 = vld [vmem:[%s1297_s1 + $0x28] sm:$0xff] (!%p204_p0)  ;;  %v239_v31 = vld [vmem:[%s1297_s1 + $0x30] sm:$0xff] (!%p204_p0)  ;;  %p894_p1 = scmp.ne.s32.totalorder (!%p204_p0), %s1239_s6, %s893_s10  ;;  %s990_s11 = smov (!%p204_p0), [#allocation3]  }
  0x2b   : > { %777 = vmatprep.subr.bf16.mxu0 %v776_v12  ;;  %781 = vmatprep.subr.bf16.mxu1 %v776_v12  ;;  %v246_v30 = vld [vmem:[%s1297_s1 + $0x68] sm:$0xff]  ;;  %v247_v32 = vld [vmem:[%s1297_s1 + $0x70] sm:$0xff]  ;;  %v261_v34 = vld [vmem:[%s1298_s2 + $0x40] sm:$0xff]  ;;  %s897_s20 = sshll.u32 %s990_s11, 4  ;;  %s898_s20 = int_to_ptr.vmem [resolvable:$false] %s897_s20 }
  0x2c   : > { %286 = vperm.xlu1 %860, %v256_v15   ;;  %276 = vperm.xlu0 %859, %v254_v16   ;;  %v262_v33 = vld [vmem:[%s1298_s2 + $0x48] sm:$0xff]  ;;  %v240_v35 = vld [vmem:[%s1297_s1 + $0x38] sm:$0xff]  ;;  %v263_v38 = vld [vmem:[%s1298_s2 + $0x50] sm:$0xff]  ;;  %p895_p2 = pnand %p894_p1, %p1074_p8  ;;  %s899_s21 = scalar_lea.vmem %s898_s20, 4096 }
  0x2d   : > { %v248_v36 = vld [vmem:[%s1297_s1 + $0x78] sm:$0xff]  ;;  %v266_v39 = vld [vmem:[%s1298_s2 + $0x68] sm:$0xff]  ;;  %v265_v40 = vld [vmem:[%s1298_s2 + $0x60] sm:$0xff]  ;;  %p900_p4 = scmp.lt.s32.totalorder %s1239_s6, %s898_s20  ;;  %p901_p5 = scmp.lt.s32.totalorder %s899_s21, %s893_s10 }
  0x2e   : > { %779 = vmatpush3.bf16.msra.mxu0 %v776_v12  ;;  %783 = vmatpush3.bf16.msra.mxu1 %v776_v12  ;;  %v264_v37 = vld [vmem:[%s1298_s2 + $0x58] sm:$0xff]  ;;  %v267_v42 = vld [vmem:[%s1298_s2 + $0x70] sm:$0xff]  ;;  %p896_p3 = pneg %p895_p2 }
  0x2f   : > { %v268_v41 = vld [vmem:[%s1298_s2 + $0x78] sm:$0xff]  ;;  %p902_p6 = por %p901_p5, %p900_p4 }
  0x30   : > { %296 = vperm.xlu1 %860, %v258_v21   ;;  %291 = vperm.xlu0 %859, %v257_v22  }
  0x31   : > { %749 = vmatmul.mubr.msk.f32.vlgmr.msra.gmra.mrb[0].mxu0 %vm349_vm0, %v234_v17  ;;  %761 = vmatmul.mubr.msk.f32.vlgmr.msra.gmra.mrb[0].mxu1 %vm349_vm0, %v242_v18  ;;  %p903_p7 = pnand %p902_p6, %p896_p3 }
  0x32   : > { %751 = vmatprep.mubr.msk.f32.mxu0 %vm349_vm0, %v235_v19  ;;  %763 = vmatprep.mubr.msk.f32.mxu1 %vm349_vm0, %v243_v20 }
  0x34   : > { %306 = vperm.xlu1 %860, %v260_v27   ;;  %301 = vperm.xlu0 %859, %v259_v28  }
  0x35   : > { %752 = vmatmul.mubr.msk.f32.gmra.mrb[2].mxu0 %vm349_vm0, %v236_v23  ;;  %764 = vmatmul.mubr.msk.f32.gmra.mrb[2].mxu1 %vm349_vm0, %v244_v24 }
  0x36   : > { %754 = vmatprep.mubr.msk.f32.mxu0 %vm349_vm0, %v237_v25  ;;  %766 = vmatprep.mubr.msk.f32.mxu1 %vm349_vm0, %v245_v26 }
  0x38   : > { %316 = vperm.xlu1 %860, %v262_v33   ;;  %311 = vperm.xlu0 %859, %v261_v34  }
  0x39   : > { %755 = vmatmul.mubr.msk.f32.gmra.mrb[4].mxu0 %vm349_vm0, %v238_v29  ;;  %767 = vmatmul.mubr.msk.f32.gmra.mrb[4].mxu1 %vm349_vm0, %v246_v30 }
  0x3a   : > { %757 = vmatprep.mubr.msk.f32.mxu0 %vm349_vm0, %v239_v31  ;;  %769 = vmatprep.mubr.msk.f32.mxu1 %vm349_vm0, %v247_v32 }
  0x3c   : > { %326 = vperm.xlu1 %860, %v264_v37   ;;  %321 = vperm.xlu0 %859, %v263_v38  }
  0x3d   : > { %758 = vmatmul.mubr.msk.f32.gmra.mrb[6].mxu0 %vm349_vm0, %v240_v35  ;;  %770 = vmatmul.mubr.msk.f32.gmra.mrb[6].mxu1 %vm349_vm0, %v248_v36 }
  0x40   : > { %336 = vperm.xlu1 %860, %v266_v39   ;;  %331 = vperm.xlu0 %859, %v265_v40  }
  0x44   : > { %346 = vperm.xlu1 %860, %v268_v41   ;;  %341 = vperm.xlu0 %859, %v267_v42  }
  0xa5   : > { %v282_v43 = vpop.permute.xlu1 %281  ;;  %v272_v44 = vpop.permute.xlu0 %271 }
  0xab   : > { %v287_v45 = vpop.permute.xlu1 %286  ;;  %v277_v46 = vpop.permute.xlu0 %276 }
  0xaf   : > { %v297_v47 = vpop.permute.xlu1 %296  ;;  %v292_v48 = vpop.permute.xlu0 %291 }
  0xb3   : > { %v307_v49 = vpop.permute.xlu1 %306  ;;  %v302_v50 = vpop.permute.xlu0 %301 }
  0xb7   : > { %v317_v51 = vpop.permute.xlu1 %316  ;;  %v312_v52 = vpop.permute.xlu0 %311 }
  0xbb   : > { %v327_v53 = vpop.permute.xlu1 %326  ;;  %v322_v54 = vpop.permute.xlu0 %321 }
  0xbf   : > { %v337_v63 = vpop.permute.xlu1 %336  ;;  %v332_v0 = vpop.permute.xlu0 %331 }
  0xc3   : > { %v347_v25 = vpop.permute.xlu1 %346  ;;  %v342_v26 = vpop.permute.xlu0 %341 }
 0x104   : > { %v750_v55 = vpop.f32.mrb[0].mxu0  ;;  %v762_v56 = vpop.f32.mrb[0].mxu1 }
 0x105   : > { %v470_v57 = vadd.f32 %v750_v55, %v277_v46  ;;  %v510_v58 = vadd.f32 %v762_v56, %v317_v51  ;;  %v464_v59 = vpop.f32.mrb[1].mxu0  ;;  %v504_v60 = vpop.f32.mrb[1].mxu1 }
 0x106   : > { %v465_v61 = vadd.f32 %v464_v59, %v272_v44  ;;  %v505_v62 = vadd.f32 %v504_v60, %v312_v52 }
 0x107   : > { %v544_v1 = vmax.f32 %v470_v57, 0.0  ;;  %v552_v2 = vmax.f32 %v510_v58, 0.0 }
 0x108   : > { %v543_v3 = vmax.f32 %v465_v61, 0.0  ;;  %v551_v4 = vmax.f32 %v505_v62, 0.0  ;;  %v753_v5 = vpop.f32.mrb[2].mxu0  ;;  %v765_v6 = vpop.f32.mrb[2].mxu1 }
 0x109   : > { %861 = vtanh.f32 %v544_v1  ;;  %v480_v7 = vadd.f32 %v753_v5, %v287_v45  ;;  %v520_v8 = vadd.f32 %v765_v6, %v327_v53  ;;  %v474_v9 = vpop.f32.mrb[3].mxu0  ;;  %v514_v10 = vpop.f32.mrb[3].mxu1 }
 0x10a   : > { %863 = vtanh.f32 %v552_v2  ;;  %v475_v11 = vadd.f32 %v474_v9, %v282_v43  ;;  %v515_v12 = vadd.f32 %v514_v10, %v322_v54 }
 0x10b   : > { %865 = vtanh.f32 %v543_v3  ;;  %v546_v13 = vmax.f32 %v480_v7, 0.0  ;;  %v554_v14 = vmax.f32 %v520_v8, 0.0 }
 0x10c   : > { %867 = vtanh.f32 %v551_v4  ;;  %v545_v15 = vmax.f32 %v475_v11, 0.0  ;;  %v553_v16 = vmax.f32 %v515_v12, 0.0  ;;  %v756_v17 = vpop.f32.mrb[4].mxu0  ;;  %v768_v18 = vpop.f32.mrb[4].mxu1 }
 0x10d   : > { %869 = vtanh.f32 %v546_v13  ;;  %v490_v19 = vadd.f32 %v756_v17, %v297_v47  ;;  %v530_v20 = vadd.f32 %v768_v18, %v337_v63  ;;  %v484_v21 = vpop.f32.mrb[5].mxu0  ;;  %v524_v22 = vpop.f32.mrb[5].mxu1 }
 0x10e   : > { %871 = vtanh.f32 %v554_v14  ;;  %v485_v23 = vadd.f32 %v484_v21, %v292_v48  ;;  %v525_v24 = vadd.f32 %v524_v22, %v332_v0 }
 0x10f   : > { %873 = vtanh.f32 %v545_v15  ;;  %v548_v27 = vmax.f32 %v490_v19, 0.0  ;;  %v556_v28 = vmax.f32 %v530_v20, 0.0 }
 0x110   : > { %875 = vtanh.f32 %v553_v16  ;;  %v547_v29 = vmax.f32 %v485_v23, 0.0  ;;  %v555_v30 = vmax.f32 %v525_v24, 0.0  ;;  %v759_v31 = vpop.f32.mrb[6].mxu0  ;;  %v771_v32 = vpop.f32.mrb[6].mxu1 }
 0x111   : > { %877 = vtanh.f32 %v548_v27  ;;  %v500_v33 = vadd.f32 %v759_v31, %v307_v49  ;;  %v540_v34 = vadd.f32 %v771_v32, %v347_v25  ;;  %v494_v35 = vpop.f32.mrb[7].mxu0  ;;  %v534_v36 = vpop.f32.mrb[7].mxu1 }
 0x112   : > { %879 = vtanh.f32 %v556_v28  ;;  %v495_v37 = vadd.f32 %v494_v35, %v302_v50  ;;  %v535_v38 = vadd.f32 %v534_v36, %v342_v26 }
 0x113   : > { %v862_v39 = vpop.eup %861  ;;  %881 = vtanh.f32 %v547_v29  ;;  %v550_v40 = vmax.f32 %v500_v33, 0.0  ;;  %v558_v41 = vmax.f32 %v540_v34, 0.0 }
 0x114   : > { %v864_v42 = vpop.eup %863  ;;  %576 = vst [vmem:[%s1216_s29 + $0x8] sm:$0xff] %v862_v39  ;;  %883 = vtanh.f32 %v555_v30  ;;  %v549_v43 = vmax.f32 %v495_v37, 0.0  ;;  %v557_v44 = vmax.f32 %v535_v38, 0.0 }
 0x115   : > { %v866_v45 = vpop.eup %865  ;;  %584 = vst [vmem:[%s1216_s29 + $0x48] sm:$0xff] %v864_v42  ;;  %885 = vtanh.f32 %v550_v40 }
 0x116   : > { %v868_v46 = vpop.eup %867  ;;  %575 = vst [vmem:[%s1216_s29] sm:$0xff] %v866_v45  ;;  %887 = vtanh.f32 %v558_v41 }
 0x117   : > { %v870_v47 = vpop.eup %869  ;;  %583 = vst [vmem:[%s1216_s29 + $0x40] sm:$0xff] %v868_v46  ;;  %889 = vtanh.f32 %v549_v43 }
 0x118   : > { %v872_v48 = vpop.eup %871  ;;  %578 = vst [vmem:[%s1216_s29 + $0x18] sm:$0xff] %v870_v47  ;;  %891 = vtanh.f32 %v557_v44 }
 0x119   : > { %v874_v49 = vpop.eup %873  ;;  %586 = vst [vmem:[%s1216_s29 + $0x58] sm:$0xff] %v872_v48 }
 0x11a   : > { %v876_v50 = vpop.eup %875  ;;  %577 = vst [vmem:[%s1216_s29 + $0x10] sm:$0xff] %v874_v49 }
 0x11b   : > { %v878_v51 = vpop.eup %877  ;;  %585 = vst [vmem:[%s1216_s29 + $0x50] sm:$0xff] %v876_v50 }
 0x11c   : > { %v880_v52 = vpop.eup %879  ;;  %580 = vst [vmem:[%s1216_s29 + $0x28] sm:$0xff] %v878_v51 }
 0x11d   : > { %v882_v53 = vpop.eup %881  ;;  %588 = vst [vmem:[%s1216_s29 + $0x68] sm:$0xff] %v880_v52 }
 0x11e   : > { %v884_v54 = vpop.eup %883  ;;  %579 = vst [vmem:[%s1216_s29 + $0x20] sm:$0xff] %v882_v53 }
 0x11f   : > { %v886_v55 = vpop.eup %885  ;;  %587 = vst [vmem:[%s1216_s29 + $0x60] sm:$0xff] %v884_v54 }
 0x120   : > { %v888_v56 = vpop.eup %887  ;;  %582 = vst [vmem:[%s1216_s29 + $0x38] sm:$0xff] %v886_v55 }
 0x121   : > { %v890_v57 = vpop.eup %889  ;;  %590 = vst [vmem:[%s1216_s29 + $0x78] sm:$0xff] %v888_v56 }
 0x122   : > { %v892_v58 = vpop.eup %891  ;;  %581 = vst [vmem:[%s1216_s29 + $0x30] sm:$0xff] %v890_v57 }
 0x123   : > { %589 = vst [vmem:[%s1216_s29 + $0x70] sm:$0xff] %v892_v58 }
 0x124   : > { %906 = shalt.err (!%p903_p7)
}
 0x125   : > { %s907_s25 = scalar_lea.hbm %s1236_s8, 2048  ;;  %s911_s30 = scalar_lea.hbm %s1299_s3, 8192 }
 0x126   : > { %p908_p10 = scmp.ne.s32.totalorder %s1236_s8, %s907_s25  ;;  %p912_p13 = scmp.lt.u32.totalorder %s1236_s8, %s1299_s3 }
 0x127   : > { %p913_p0 = scmp.lt.u32.totalorder %s911_s30, %s907_s25  ;;  %p915_p2 = scmp.lt.u32.totalorder %s907_s25, %s1236_s8 }
 0x128   : > { %p909_p11 = pnand %p908_p10, %p1074_p8 }
 0x129   : > { %p914_p1 = por %p913_p0, %p912_p13 }
 0x12a   : > { %p910_p12 = pneg %p909_p11 }
 0x12b   : > { %p916_p3 = por %p915_p2, %p914_p1 }
 0x12d   : > { %p917_p4 = pnand %p916_p3, %p910_p12 }
 0x12f   : > { %920 = shalt.err (!%p917_p4)
}
 0x130   : > { %s991_s15 = smov 128   ;;  %s992_s7 = smov 256  }
 0x131   : > { %s993_s10 = smov 8  }
 0x132   : > { %784 = dma.vmem_to_hbm [thread:$0]  (%p1074_p8), %s1239_s6, 2048, %s1236_s8, %s592_s9, %s991_s15, %s992_s7, %s993_s10  }
 0x133 PF: > { %p790_p5 = scmp.ge.s32.totalorder %s987_s19, 2  ;;  %s621_s11 = sand.u32 1, %s959_s12  }
 0x134   : > { %s622_s20 = scalar_lea.sflag [#allocation4], %s621_s11 }
 0x135   : > { %p787_p6 = pnand %p790_p5, %p1078_p9 }
 0x137   : > { %954 = dma.done.wait (!%p787_p6), %s622_s20, 2048  }
 0x138   : > { %956 = vsyncadd (!%p787_p6), %s622_s20, 4294965248  ;;  %s16_s19 = sadd.s32 1, %s987_s19   ;;  %s1303_s12 = smov %s963_s13 }
 0x139   : > { %p13_p7 = scmp.ge.s32.totalorder %s16_s19, 6   ;;  %s1304_s13 = smov %s967_s14 }
 0x13a   : > { %s1305_s14 = smov %s1086_s4  ;;  %s1306_s15 = smov %s979_s17 }
 0x13b   : > { %s1307_s16 = smov %s983_s18  ;;  %s1308_s17 = smov %s1311_s22 }
 0x13c   : > { %s1309_s18 = smov %s1315_s23  ;;  %15 = sbr.rel (!%p13_p7) target bundleno = 5 (0x5), region = 110 }
 0x143   :  { %627 = vsyncpa [#allocation4], 1 }
 0x144   :  { %629 = vsyncpa [#allocation4 + $0x1], 1 }

</bundles_post_ra>
